<compile_context>
chip_gen: v5e
topology: v5e:2x2
jax: 0.10.0
libtpu: 0.0.40
codegen_flags: <defaults>
</compile_context>

<pallas_src>
import numpy as np
import jax
import jax.numpy as jnp
from jax.experimental import pallas as pl
from jax.experimental.pallas import tpu as pltpu


# ---------------------------------------------------------------------------
# Kernel: full 3-layer MLP for one chunk of lane-packed posterior samples.
# ---------------------------------------------------------------------------
def _bnn_chunk_kernel(x_ref, w1_ref, b1_ref, w2_ref, b2_ref, w3_ref, b3_ref,
                      o_ref):
    x = x_ref[...]                       # (N, D)

    # layer 0: shared x -> all samples' latents at once, ReLU
    h = jnp.dot(x, w1_ref[0], preferred_element_type=jnp.float32) + b1_ref[0]
    h = jnp.maximum(h, 0.0)              # (N, SC*H)

    # layer 1: block-diagonal (per-sample) latent -> latent, ReLU
    h = jnp.dot(h, w2_ref[0], preferred_element_type=jnp.float32) + b2_ref[0]
    h = jnp.maximum(h, 0.0)              # (N, SC*H)

    # layer 2 (output): block-diagonal latent -> output, no activation
    out = jnp.dot(h, w3_ref[0], preferred_element_type=jnp.float32) + b3_ref[0]

    o_ref[0] = out.astype(o_ref.dtype)   # (N, SC*O)


def bnn_likelihood_forward(x, theta, *, input_dim, latent_dim, output_dim,
                           num_layers=2, num_chunks=None):
    """JAX/Pallas equivalent of FullyConnectedBNN.likelihood_forward.

    x:     (N, input_dim) float32
    theta: (S, num_parameters) float32
    returns logits of shape (S, N, output_dim)   (samples_first=True)
    """
    assert num_layers == 2, "kernel specialised to the default num_layers=2"
    N, D = x.shape
    S = theta.shape[0]
    H, O = latent_dim, output_dim

    # ---- reshape_theta (layout work stays in plain JAX, tiny tensors) ----
    shapes = [(D + 1, H), (H + 1, H), (H + 1, O)]
    sizes = [int(np.prod(s)) for s in shapes]
    assert theta.shape[-1] == sum(sizes)
    offs = np.cumsum([0] + sizes)
    th = [theta[:, o1:o2].reshape((S,) + shp)
          for shp, o1, o2 in zip(shapes, offs[:-1], offs[1:])]

    # Split the appended-ones bias row off each (in+1, out) matrix.
    W1, b1 = th[0][:, :D, :], th[0][:, D, :]     # (S, D, H), (S, H)
    W2, b2 = th[1][:, :H, :], th[1][:, H, :]     # (S, H, H), (S, H)
    W3, b3 = th[2][:, :H, :], th[2][:, H, :]     # (S, H, O), (S, O)

    # 2 chunks -> 2 parallel grid steps (v7x dual TensorCore); else 1.
    if num_chunks is None:
        num_chunks = 2 if S % 2 == 0 else 1
    C = num_chunks
    assert S % C == 0
    SC = S // C

    # Layer 1: pack samples along the output/lane axis (shared input x).
    W1p = W1.reshape(C, SC, D, H).transpose(0, 2, 1, 3).reshape(C, D, SC * H)
    b1p = b1.reshape(C, 1, SC * H)

    # Layers 2/3: per-sample matmuls as lane-packed block-diagonal matmuls.
    def block_diag(W):  # (S, A, B) -> (C, SC*A, SC*B), block-diagonal per chunk
        A, B = W.shape[1], W.shape[2]
        Wc = W.reshape(C, SC, A, B)
        eye = jnp.eye(SC, dtype=W.dtype)
        return jnp.einsum('ij,ciab->ciajb', eye, Wc).reshape(C, SC * A, SC * B)

    W2p = block_diag(W2)                 # (C, SC*H, SC*H)
    b2p = b2.reshape(C, 1, SC * H)
    W3p = block_diag(W3)                 # (C, SC*H, SC*O)
    b3p = b3.reshape(C, 1, SC * O)

    out = pl.pallas_call(
        _bnn_chunk_kernel,
        out_shape=jax.ShapeDtypeStruct((C, N, SC * O), jnp.float32),
        grid_spec=pltpu.PrefetchScalarGridSpec(
            num_scalar_prefetch=0,
            grid=(C,),
            in_specs=[
                pl.BlockSpec((N, D), lambda c: (0, 0)),            # x resident
                pl.BlockSpec((1, D, SC * H), lambda c: (c, 0, 0)),
                pl.BlockSpec((1, 1, SC * H), lambda c: (c, 0, 0)),
                pl.BlockSpec((1, SC * H, SC * H), lambda c: (c, 0, 0)),
                pl.BlockSpec((1, 1, SC * H), lambda c: (c, 0, 0)),
                pl.BlockSpec((1, SC * H, SC * O), lambda c: (c, 0, 0)),
                pl.BlockSpec((1, 1, SC * O), lambda c: (c, 0, 0)),
            ],
            out_specs=pl.BlockSpec((1, N, SC * O), lambda c: (c, 0, 0)),
        ),
        compiler_params=pltpu.CompilerParams(
            dimension_semantics=("parallel",)),
    )(x, W1p, b1p, W2p, b2p, W3p, b3p)

    # Un-pack lanes: (C, N, SC, O) -> (S, N, O)  (samples_first=True).
    out = out.reshape(C, N, SC, O).transpose(0, 2, 1, 3).reshape(S, N, O)
    return out


# Pure-JAX reference (mirrors the PyTorch code: cat ones column, matmul).
def _reference(x, theta, *, input_dim, latent_dim, output_dim):
    N, D = x.shape
    S = theta.shape[0]
    H, O = latent_dim, output_dim
    shapes = [(D + 1, H), (H + 1, H), (H + 1, O)]
    sizes = [int(np.prod(s)) for s in shapes]
    offs = np.cumsum([0] + sizes)
    ws = [theta[:, o1:o2].reshape((S,) + shp)
          for shp, o1, o2 in zip(shapes, offs[:-1], offs[1:])]
    h = jnp.broadcast_to(x[None], (S, N, D))
    for i, W in enumerate(ws):
        h = jnp.concatenate([h, jnp.ones((S, N, 1), h.dtype)], axis=-1)
        h = jnp.einsum("snd,sdo->sno", h, W)
        if i < len(ws) - 1:
            h = jax.nn.relu(h)
    return h


if __name__ == "__main__":
    # Default-ish config: num_predictive_samples=10, shrunk latent_dim, 2 layers
    S = 10           # num_predictive_samples
    N = 8            # batch
    input_dim = 16
    latent_dim = 32
    output_dim = 4

    sizes = [(input_dim + 1) * latent_dim,
             (latent_dim + 1) * latent_dim,
             (latent_dim + 1) * output_dim]
    num_parameters = sum(sizes)

    key = jax.random.PRNGKey(0)
    kx, kt = jax.random.split(key)
    x = jax.random.normal(kx, (N, input_dim), dtype=jnp.float32)
    # theta plays the role of q.distribution.sample((S,)) — deterministic here.
    theta = 0.1 * jax.random.normal(kt, (S, num_parameters), dtype=jnp.float32)

    logits = bnn_likelihood_forward(
        x, theta, input_dim=input_dim, latent_dim=latent_dim,
        output_dim=output_dim, num_layers=2)
    logits = jax.block_until_ready(logits)

    ref = _reference(x, theta, input_dim=input_dim, latent_dim=latent_dim,
                     output_dim=output_dim)
    assert logits.shape == (S, N, output_dim)
    assert np.allclose(np.asarray(logits), np.asarray(ref), atol=1e-4, rtol=1e-4)

    # TODO(synk): pred_dist_from_tensor / MixtureSameFamily(Categorical) are
    # torch.distributions objects with no Pallas equivalent; the kernel returns
    # the per-sample logits tensor that parameterises the mixture components.
    print("KERNEL_OK")
</pallas_src>

<mosaic_0001>
module attributes {stable_mosaic.version = 11 : i64} {
  func.func @_bnn_chunk_kernel(%arg0: i32, %arg1: memref<8x16xf32, #tpu.memory_space<vmem>>, %arg2: memref<1x16x160xf32, #tpu.memory_space<vmem>>, %arg3: memref<1x1x160xf32, #tpu.memory_space<vmem>>, %arg4: memref<1x160x160xf32, #tpu.memory_space<vmem>>, %arg5: memref<1x1x160xf32, #tpu.memory_space<vmem>>, %arg6: memref<1x160x20xf32, #tpu.memory_space<vmem>>, %arg7: memref<1x1x20xf32, #tpu.memory_space<vmem>>, %arg8: memref<1x8x20xf32, #tpu.memory_space<vmem>>) attributes {dimension_semantics = [#tpu.dimension_semantics<parallel>], iteration_bounds = array<i64: 2>, scalar_prefetch = 0 : i64, scratch_operands = 0 : i64, tpu.core_type = #tpu.core_type<tc>, window_params = [{pipeline_mode = #tpu.pipeline_mode<synchronous>, transform_indices = @transform_0, window_bounds = array<i64: 8, 16>}, {transform_indices = @transform_1, window_bounds = array<i64: 1, 16, 160>}, {transform_indices = @transform_2, window_bounds = array<i64: 1, 1, 160>}, {transform_indices = @transform_3, window_bounds = array<i64: 1, 160, 160>}, {transform_indices = @transform_4, window_bounds = array<i64: 1, 1, 160>}, {transform_indices = @transform_5, window_bounds = array<i64: 1, 160, 20>}, {transform_indices = @transform_6, window_bounds = array<i64: 1, 1, 20>}, {transform_indices = @transform_7, window_bounds = array<i64: 1, 8, 20>}]} {
    %c0 = arith.constant 0 : index
    %c0_0 = arith.constant 0 : index
    %0 = vector.load %arg1[%c0, %c0_0] : memref<8x16xf32, #tpu.memory_space<vmem>>, vector<8x16xf32>
    %c0_1 = arith.constant 0 : index
    %c0_2 = arith.constant 0 : index
    %c0_3 = arith.constant 0 : index
    %1 = vector.load %arg2[%c0_1, %c0_2, %c0_3] : memref<1x16x160xf32, #tpu.memory_space<vmem>>, vector<1x16x160xf32>
    %2 = vector.shape_cast %1 : vector<1x16x160xf32> to vector<16x160xf32>
    %cst = arith.constant dense<0.000000e+00> : vector<8x160xf32>
    %3 = tpu.matmul %0, %2, %cst {dimension_numbers = #tpu.dot_dimension_numbers<[1], [0], [0], [1], [0, 0, 1, 1], [], []>} : vector<8x16xf32>, vector<16x160xf32>, vector<8x160xf32> -> vector<8x160xf32>
    %c0_4 = arith.constant 0 : index
    %c0_5 = arith.constant 0 : index
    %c0_6 = arith.constant 0 : index
    %4 = vector.load %arg3[%c0_4, %c0_5, %c0_6] : memref<1x1x160xf32, #tpu.memory_space<vmem>>, vector<1x1x160xf32>
    %5 = vector.shape_cast %4 : vector<1x1x160xf32> to vector<1x160xf32>
    %6 = vector.broadcast %5 : vector<1x160xf32> to vector<8x160xf32>
    %7 = arith.addf %3, %6 : vector<8x160xf32>
    %cst_7 = arith.constant 0.000000e+00 : f32
    %8 = vector.broadcast %cst_7 : f32 to vector<8x160xf32>
    %9 = arith.maximumf %7, %8 : vector<8x160xf32>
    %c0_8 = arith.constant 0 : index
    %c0_9 = arith.constant 0 : index
    %c0_10 = arith.constant 0 : index
    %10 = vector.load %arg4[%c0_8, %c0_9, %c0_10] : memref<1x160x160xf32, #tpu.memory_space<vmem>>, vector<1x160x160xf32>
    %11 = vector.shape_cast %10 : vector<1x160x160xf32> to vector<160x160xf32>
    %cst_11 = arith.constant dense<0.000000e+00> : vector<8x160xf32>
    %12 = tpu.matmul %9, %11, %cst_11 {dimension_numbers = #tpu.dot_dimension_numbers<[1], [0], [0], [1], [0, 0, 1, 1], [], []>} : vector<8x160xf32>, vector<160x160xf32>, vector<8x160xf32> -> vector<8x160xf32>
    %c0_12 = arith.constant 0 : index
    %c0_13 = arith.constant 0 : index
    %c0_14 = arith.constant 0 : index
    %13 = vector.load %arg5[%c0_12, %c0_13, %c0_14] : memref<1x1x160xf32, #tpu.memory_space<vmem>>, vector<1x1x160xf32>
    %14 = vector.shape_cast %13 : vector<1x1x160xf32> to vector<1x160xf32>
    %15 = vector.broadcast %14 : vector<1x160xf32> to vector<8x160xf32>
    %16 = arith.addf %12, %15 : vector<8x160xf32>
    %cst_15 = arith.constant 0.000000e+00 : f32
    %17 = vector.broadcast %cst_15 : f32 to vector<8x160xf32>
    %18 = arith.maximumf %16, %17 : vector<8x160xf32>
    %c0_16 = arith.constant 0 : index
    %c0_17 = arith.constant 0 : index
    %c0_18 = arith.constant 0 : index
    %19 = vector.load %arg6[%c0_16, %c0_17, %c0_18] : memref<1x160x20xf32, #tpu.memory_space<vmem>>, vector<1x160x20xf32>
    %20 = vector.shape_cast %19 : vector<1x160x20xf32> to vector<160x20xf32>
    %cst_19 = arith.constant dense<0.000000e+00> : vector<8x20xf32>
    %21 = tpu.matmul %18, %20, %cst_19 {dimension_numbers = #tpu.dot_dimension_numbers<[1], [0], [0], [1], [0, 0, 1, 1], [], []>} : vector<8x160xf32>, vector<160x20xf32>, vector<8x20xf32> -> vector<8x20xf32>
    %c0_20 = arith.constant 0 : index
    %c0_21 = arith.constant 0 : index
    %c0_22 = arith.constant 0 : index
    %22 = vector.load %arg7[%c0_20, %c0_21, %c0_22] : memref<1x1x20xf32, #tpu.memory_space<vmem>>, vector<1x1x20xf32>
    %23 = vector.shape_cast %22 : vector<1x1x20xf32> to vector<1x20xf32>
    %24 = vector.broadcast %23 : vector<1x20xf32> to vector<8x20xf32>
    %25 = arith.addf %21, %24 : vector<8x20xf32>
    %c0_23 = arith.constant 0 : index
    %c0_24 = arith.constant 0 : index
    %c0_25 = arith.constant 0 : index
    %26 = vector.load %arg8[%c0_23, %c0_24, %c0_25] : memref<1x8x20xf32, #tpu.memory_space<vmem>>, vector<1x8x20xf32>
    %27 = vector.shape_cast %26 : vector<1x8x20xf32> to vector<8x20xf32>
    %28 = vector.shape_cast %25 : vector<8x20xf32> to vector<1x8x20xf32>
    tpu.vector_store %arg8[%c0_23, %c0_24, %c0_25], %28 {strides = array<i32>} : memref<1x8x20xf32, #tpu.memory_space<vmem>>, vector<1x8x20xf32>,
    return
  }
  func.func @transform_0(%arg0: i32) -> (i32, i32) {
    %c0_i32 = arith.constant 0 : i32
    %c0_i32_0 = arith.constant 0 : i32
    %c0_i32_1 = arith.constant 0 : i32
    return %c0_i32, %c0_i32_0 : i32, i32
  }
  func.func @transform_1(%arg0: i32) -> (i32, i32, i32) {
    %c0_i32 = arith.constant 0 : i32
    %c0_i32_0 = arith.constant 0 : i32
    %c0_i32_1 = arith.constant 0 : i32
    return %arg0, %c0_i32, %c0_i32_0 : i32, i32, i32
  }
  func.func @transform_2(%arg0: i32) -> (i32, i32, i32) {
    %c0_i32 = arith.constant 0 : i32
    %c0_i32_0 = arith.constant 0 : i32
    %c0_i32_1 = arith.constant 0 : i32
    return %arg0, %c0_i32, %c0_i32_0 : i32, i32, i32
  }
  func.func @transform_3(%arg0: i32) -> (i32, i32, i32) {
    %c0_i32 = arith.constant 0 : i32
    %c0_i32_0 = arith.constant 0 : i32
    %c0_i32_1 = arith.constant 0 : i32
    return %arg0, %c0_i32, %c0_i32_0 : i32, i32, i32
  }
  func.func @transform_4(%arg0: i32) -> (i32, i32, i32) {
    %c0_i32 = arith.constant 0 : i32
    %c0_i32_0 = arith.constant 0 : i32
    %c0_i32_1 = arith.constant 0 : i32
    return %arg0, %c0_i32, %c0_i32_0 : i32, i32, i32
  }
  func.func @transform_5(%arg0: i32) -> (i32, i32, i32) {
    %c0_i32 = arith.constant 0 : i32
    %c0_i32_0 = arith.constant 0 : i32
    %c0_i32_1 = arith.constant 0 : i32
    return %arg0, %c0_i32, %c0_i32_0 : i32, i32, i32
  }
  func.func @transform_6(%arg0: i32) -> (i32, i32, i32) {
    %c0_i32 = arith.constant 0 : i32
    %c0_i32_0 = arith.constant 0 : i32
    %c0_i32_1 = arith.constant 0 : i32
    return %arg0, %c0_i32, %c0_i32_0 : i32, i32, i32
  }
  func.func @transform_7(%arg0: i32) -> (i32, i32, i32) {
    %c0_i32 = arith.constant 0 : i32
    %c0_i32_0 = arith.constant 0 : i32
    %c0_i32_1 = arith.constant 0 : i32
    return %arg0, %c0_i32, %c0_i32_0 : i32, i32, i32
  }
}

</mosaic_0001>

<bundles_post_ra>
// kernel: tpu_custom_call.1
= control target key start
LH: loop header
LB: loop body
LE: loop exit
PB: predicated region body
PF: predicated region fallthrough
CT: control target
= control target key end

     0   :  { %12 = vsyncpa [#allocation3], 0  ;;  %s1217_s0 = inlined_call_operand.vmem [shape: f32[8,16], index: 0, kind: input, shape index: {}]   ;;  %s1218_s1 = inlined_call_operand.vmem [shape: f32[2,16,160], index: 1, kind: input, shape index: {}]   ;;  %s1219_s2 = inlined_call_operand.vmem [shape: f32[2,1,160], index: 2, kind: input, shape index: {}]   ;;  %s1220_s3 = inlined_call_operand.hbm [shape: f32[2,160,160], index: 3, kind: input, shape index: {}]   ;;  %s1221_s4 = inlined_call_operand.vmem [shape: f32[2,1,160], index: 4, kind: input, shape index: {}]   ;;  %s1222_s5 = inlined_call_operand.vmem [shape: f32[2,160,20], index: 5, kind: input, shape index: {}]   ;;  %s1223_s6 = inlined_call_operand.vmem [shape: f32[2,1,20], index: 6, kind: input, shape index: {}]   ;;  %s1224_s7 = inlined_call_operand.hbm [shape: f32[2,8,20], index: 7, kind: output, shape index: {}]  }
   0x1   :  { %14 = vsyncpa [#allocation3 + $0x1], 0 }
   0x2   :  { %15 = vsyncpa [#allocation4], 0 }
   0x3   :  { %17 = vsyncpa [#allocation4 + $0x1], 0  ;;  %s1002_s24 = smov 0   ;;  %s1004_s25 = smov 0  }
   0x4   :  { %s1006_s26 = smov 0   ;;  %s1008_s27 = smov 0  }
   0x5 LB: > { %1226 = sst [smem:[#allocation8_spill]] %s954_s26  ;;  %s1023_s28 = sadd.s32 4294967295, %s958_s27   ;;  %s958_s27 = sphi %s1008_s27, %s1236_s27   ;;  %s954_s26 = sphi %s1006_s26, %s1233_s26   ;;  %s950_s25 = sphi %s1004_s25, %s1235_s25   ;;  %s946_s24 = sphi %s1002_s24, %s1234_s24  }
   0x6   : > { %s788_s29 = sadd.s32 4294967294, %s958_s27   ;;  %s1027_s30 = sadd.s32 1, %s958_s27  }
   0x7   : > { %s103_s8 = sadd.s32 1, %s954_s26  ;;  %s100_s9 = ssub.s32 %s958_s27, %s1027_s30 }
   0x8   : > { %p110_p0 = scmp.ne.s32.totalorder %s954_s26, %s950_s25  ;;  %p101_p1 = scmp.eq.s32.totalorder %s100_s9, 0 }
   0x9   : > { %p111_p2 = scmp.eq.s32.totalorder %s958_s27, 0  ;;  %p116_p3 = scmp.ne.s32.totalorder %s950_s25, %s946_s24 }
   0xa   : > { %p117_p4 = scmp.eq.s32.totalorder %s1023_s28, 0  ;;  %p218_p7 = scmp.eq.s32.totalorder %s1023_s28, 1 }
   0xb   : > { %s1039_s10 = scalar_select %p101_p1, %s954_s26, %s103_s8  }
   0xc   : > { %p112_p5 = por %p111_p2, %p110_p0  ;;  %p1041_p6 = por %p117_p4, %p116_p3 }
   0xd   : > { %1227 = sst [smem:[#allocation9_spill]] %s1039_s10  ;;  %p224_p8 = scmp.eq.s32.totalorder %s788_s29, 1 }
   0xe   : > { %p790_p9 = scmp.ge.s32.totalorder %s958_s27, 2  ;;  %p825_p10 = scmp.lt.s32.totalorder %s958_s27, 2 }
   0xf   : > { %p1048_p11 = por %p218_p7, %p110_p0  ;;  %p1052_p12 = por %p224_p8, %p116_p3 }
  0x10   : > { %s262_s14 = sand.u32 1, %s954_s26   ;;  %s810_s15 = smul.u32 320, %s958_s27 }
  0x11   : > { %s809_s16 = smul.u32 320, %s262_s14  ;;  %p1061_p13 = pnand %p825_p10, %p112_p5 }
  0x12   : > { %s271_s19 = scalar_lea.hbm %s1220_s3, %s810_s15  ;;  %s263_s29 = scalar_lea.sflag [#allocation3], %s262_s14 }
  0x13   : > { %s272_s21 = sshll.u32 %s271_s19, 4  ;;  %s266_s22 = scalar_lea.vmem [#allocation2], %s809_s16  ;;  %s273_s21 = int_to_ptr.hbm [resolvable:$true] %s272_s21 }
  0x14   : > { %s274_s23 = sshll.u32 %s266_s22, 4  ;;  %s862_s8 = sshra.s32 %s273_s21, 4  ;;  %s275_s23 = int_to_ptr.vmem [resolvable:$true] %s274_s23  ;;  %s863_s8 = int_to_ptr.hbm [resolvable:$true] %s862_s8 }
  0x15   : > { %s864_s9 = scalar_lea.hbm %s863_s8, 320  ;;  %p866_p1 = pneg %p1061_p13 }
  0x16   : > { %p865_p0 = scmp.ne.s32.totalorder %s863_s8, %s864_s9  ;;  %s869_s18 = scalar_lea.hbm %s1220_s3, 640 }
  0x17   : > { %p870_p4 = scmp.lt.s32.totalorder %s863_s8, %s1220_s3  ;;  %p871_p5 = scmp.lt.s32.totalorder %s869_s18, %s864_s9 }
  0x18   : > { %p867_p2 = pnand %p866_p1, %p865_p0 }
  0x19   : > { %p872_p7 = por %p871_p5, %p870_p4 }
  0x1a   : > { %p868_p3 = pneg %p867_p2 }
  0x1c   : > { %p873_p8 = pnand %p872_p7, %p868_p3 }
  0x1e   : > { %876 = shalt.err (!%p873_p8)
}
  0x1f   : > { %s960_s14 = smov 256   ;;  %s961_s16 = smov 16  }
  0x20   : > { %820 = dma.hbm_to_vmem [thread:$0]  (!%p1061_p13), %s273_s21, 5120, %s275_s23, %s263_s29, %s960_s14, %s960_s14, %s961_s16  }
  0x21   : > { %p792_p10 = scmp.ge.s32.totalorder %s958_s27, 1  ;;  %p303_p0 = scmp.lt.s32.totalorder %s958_s27, 3 }
  0x23   : > { %p304_p1 = pnand %p792_p10, %p303_p0 }
  0x24   : > { %s1078_s19 = sand.u32 (!%p304_p1), 1, %s950_s25  }
  0x25   : > { %307 = sbr.rel (%p304_p1) target bundleno = 460 (0x1cc), region = 48  ;;  %s310_s10 = scalar_lea.sflag (!%p304_p1), [#allocation3], %s1078_s19 }
  0x26   : > { %s811_s26 = smul.u32 (!%p304_p1), 320, %s1078_s19 }
  0x28   : > { %s1082_s22 = scalar_lea.vmem (!%p304_p1), [#allocation2], %s811_s26 }
  0x2a   : > { %937 = dma.done.wait (%p1041_p6), %s310_s10, 5120  }
  0x2b   : > { %939 = vsyncadd (%p1041_p6), %s310_s10, 4294962176  ;;  %p366_p13 = scmp.lt.s32.totalorder %s1023_s28, 1  ;;  %v387_v4 = vld [vmem:[%s1217_s0] sm:$0xff]  ;;  %vm398_vm0 = vcmask 130048   ;;  %v474_v5 = vld [vmem:[%s1082_s22 + $0xf0] sm:$0xff]  ;;  %vm490_vm1 = vcmask 261120  }
  0x2c   : > { %494 = vmatpush.msra.mxu2 %v474_v5  ;;  %v475_v6 = vld [vmem:[%s1082_s22 + $0xf8] sm:$0xff]  ;;  %v472_v7 = vld [vmem:[%s1082_s22 + $0xe0] sm:$0xff]  ;;  %v473_v8 = vld [vmem:[%s1082_s22 + $0xe8] sm:$0xff]  ;;  %s805_s17 = sshll.u32 %s1023_s28, 3  ;;  %vm643_vm2 = vcmask 162816  }
  0x2d   : > { %s1090_s20 = scalar_select %p366_p13, %s1023_s28, 1  ;;  %v470_v9 = vld [vmem:[%s1082_s22 + $0xd0] sm:$0xff]  ;;  %v471_v10 = vld [vmem:[%s1082_s22 + $0xd8] sm:$0xff]  ;;  %v468_v11 = vld [vmem:[%s1082_s22 + $0xc0] sm:$0xff] }
  0x2e   : > { %495 = vmatpush.msra.mxu2 %v472_v7  ;;  %v469_v12 = vld [vmem:[%s1082_s22 + $0xc8] sm:$0xff]  ;;  %v466_v13 = vld [vmem:[%s1082_s22 + $0xb0] sm:$0xff]  ;;  %v467_v14 = vld [vmem:[%s1082_s22 + $0xb8] sm:$0xff] }
  0x2f   : > { %s808_s21 = sshll.u32 %s1090_s20, 5  ;;  %v464_v15 = vld [vmem:[%s1082_s22 + $0xa0] sm:$0xff]  ;;  %v482_v16 = vld [vmem:[%s1082_s22 + $0x130] sm:$0xff]  ;;  %v465_v17 = vld [vmem:[%s1082_s22 + $0xa8] sm:$0xff]  ;;  %s812_s15 = smul.u32 160, %s1090_s20 }
  0x30   : > { %s370_s8 = scalar_lea.vmem %s1218_s1, %s808_s21  ;;  %496 = vmatpush.msra.mxu2 %v470_v9  ;;  %v462_v18 = vld [vmem:[%s1082_s22 + $0x90] sm:$0xff]  ;;  %v463_v19 = vld [vmem:[%s1082_s22 + $0x98] sm:$0xff]  ;;  %v460_v20 = vld [vmem:[%s1082_s22 + $0x80] sm:$0xff]  ;;  %s796_s16 = sshll.u32 %s1090_s20, 1 }
  0x31   : > { %v390_v0 = vld [vmem:[%s370_s8 + $0x10] sm:$0xff]  ;;  %v391_v1 = vld [vmem:[%s370_s8 + $0x18] sm:$0xff]  ;;  %v388_v2 = vld [vmem:[%s370_s8] sm:$0xff]  ;;  %s1142_s14 = scalar_lea.vmem %s1222_s5, %s812_s15  ;;  %s378_s29 = scalar_lea.vmem %s1221_s4, %s796_s16 }
  0x32   : > { %416 = vmatpush.msra.mxu0 %v390_v0  ;;  %436 = vmatpush.msra.mxu1 %v391_v1  ;;  %v389_v3 = vld [vmem:[%s370_s8 + $0x8] sm:$0xff]  ;;  %v458_v22 = vld [vmem:[%s1082_s22 + $0x70] sm:$0xff]  ;;  %v459_v23 = vld [vmem:[%s1082_s22 + $0x78] sm:$0xff]  ;;  %s386_s9 = scalar_lea.vmem %s1223_s6, %s1090_s20  ;;  %s793_s15 = sshll.u32 %s1078_s19, 3 }
  0x33   : > { %497 = vmatpush.msra.mxu2 %v468_v11  ;;  %v461_v21 = vld [vmem:[%s1082_s22 + $0x88] sm:$0xff]  ;;  %v456_v24 = vld [vmem:[%s1082_s22 + $0x60] sm:$0xff]  ;;  %v454_v26 = vld [vmem:[%s1082_s22 + $0x50] sm:$0xff]  ;;  %s365_s26 = scalar_lea.vmem [#allocation5], %s793_s15  ;;  %s646_s20 = scalar_lea.sflag [#allocation4], %s1078_s19 }
  0x34   : > { %417 = vmatpush.msra.mxu0 %v388_v2  ;;  %437 = vmatpush.msra.mxu1 %v389_v3  ;;  %v457_v25 = vld [vmem:[%s1082_s22 + $0x68] sm:$0xff]  ;;  %v455_v27 = vld [vmem:[%s1082_s22 + $0x58] sm:$0xff]  ;;  %v452_v28 = vld [vmem:[%s1082_s22 + $0x40] sm:$0xff]  ;;  %s658_s10 = sshll.u32 %s365_s26, 4  ;;  %s912_s8 = scalar_lea.hbm %s1224_s7, 16  ;;  %s659_s10 = int_to_ptr.vmem [resolvable:$true] %s658_s10 }
  0x35   : > { %799 = vmatmul.msk.f32.vlgmr.msra.gmra.mxu0 %vm398_vm0, %v387_v4  ;;  %800 = vmatmul.msk.f32.vlgmr.msra.gmra.mxu1 %vm398_vm0, %v387_v4  ;;  %v453_v29 = vld [vmem:[%s1082_s22 + $0x48] sm:$0xff]  ;;  %v450_v30 = vld [vmem:[%s1082_s22 + $0x30] sm:$0xff]  ;;  %v451_v31 = vld [vmem:[%s1082_s22 + $0x38] sm:$0xff] }
  0x36   : > { %534 = vmatpush.msrb.mxu0 %v475_v6  ;;  %498 = vmatpush.msra.mxu2 %v466_v13  ;;  %v448_v32 = vld [vmem:[%s1082_s22 + $0x20] sm:$0xff]  ;;  %v449_v34 = vld [vmem:[%s1082_s22 + $0x28] sm:$0xff]  ;;  %v446_v35 = vld [vmem:[%s1082_s22 + $0x10] sm:$0xff] }
  0x37   : > { %526 = vmatpush.msrb.mxu1 %v482_v16  ;;  %v480_v33 = vld [vmem:[%s1082_s22 + $0x120] sm:$0xff]  ;;  %v478_v36 = vld [vmem:[%s1082_s22 + $0x110] sm:$0xff]  ;;  %v447_v37 = vld [vmem:[%s1082_s22 + $0x18] sm:$0xff] }
  0x38   : > { %535 = vmatpush.msrb.mxu0 %v473_v8  ;;  %499 = vmatpush.msra.mxu2 %v464_v15  ;;  %v444_v38 = vld [vmem:[%s1082_s22] sm:$0xff]  ;;  %v445_v40 = vld [vmem:[%s1082_s22 + $0x8] sm:$0xff]  ;;  %v483_v41 = vld [vmem:[%s1082_s22 + $0x138] sm:$0xff] }
  0x39   : > { %527 = vmatpush.msrb.mxu1 %v480_v33  ;;  %v476_v39 = vld [vmem:[%s1082_s22 + $0x100] sm:$0xff]  ;;  %v481_v42 = vld [vmem:[%s1082_s22 + $0x128] sm:$0xff]  ;;  %v479_v43 = vld [vmem:[%s1082_s22 + $0x118] sm:$0xff] }
  0x3a   : > { %536 = vmatpush.msrb.mxu0 %v471_v10  ;;  %500 = vmatpush.msra.mxu2 %v462_v18  ;;  %v477_v44 = vld [vmem:[%s1082_s22 + $0x108] sm:$0xff]  ;;  %v591_v45 = vld [vmem:[%s1142_s14 + $0x78] sm:$0xff]  ;;  %v590_v46 = vld [vmem:[%s1142_s14 + $0x70] sm:$0xff]  ;;  %s374_s22 = scalar_lea.vmem %s1219_s2, %s796_s16  ;;  %s656_s16 = scalar_lea.hbm %s1224_s7, %s805_s17 }
  0x3b   : > { %528 = vmatpush.msrb.mxu1 %v478_v36  ;;  %603 = vmatpush.msra.mxu3 %v591_v45  ;;  %v589_v47 = vld [vmem:[%s1142_s14 + $0x68] sm:$0xff]  ;;  %v588_v48 = vld [vmem:[%s1142_s14 + $0x60] sm:$0xff]  ;;  %v587_v49 = vld [vmem:[%s1142_s14 + $0x58] sm:$0xff] }
  0x3c   : > { %537 = vmatpush.msrb.mxu0 %v469_v12  ;;  %501 = vmatpush.msra.mxu2 %v460_v20  ;;  %v586_v50 = vld [vmem:[%s1142_s14 + $0x50] sm:$0xff]  ;;  %v585_v51 = vld [vmem:[%s1142_s14 + $0x48] sm:$0xff]  ;;  %v584_v52 = vld [vmem:[%s1142_s14 + $0x40] sm:$0xff] }
  0x3d   : > { %529 = vmatpush.msrb.mxu1 %v476_v39  ;;  %604 = vmatpush.msra.mxu3 %v590_v46  ;;  %v392_v53 = vld [vmem:[%s374_s22] sm:$0x3]  ;;  %v583_v54 = vld [vmem:[%s1142_s14 + $0x38] sm:$0xff]  ;;  %v582_v63 = vld [vmem:[%s1142_s14 + $0x30] sm:$0xff]  ;;  %s660_s22 = sshll.u32 %s656_s16, 4  ;;  %s661_s22 = int_to_ptr.hbm [resolvable:$true] %s660_s22 }
  0x3e   : > { %538 = vmatpush.msrb.mxu0 %v467_v14  ;;  %502 = vmatpush.msra.mxu2 %v458_v22  ;;  %v394_v55 = vperm.slane %v392_v53, 0  ;;  %v395_v56 = vperm.slane %v392_v53, 1  ;;  %v581_v0 = vld [vmem:[%s1142_s14 + $0x28] sm:$0xff]  ;;  %v580_v1 = vld [vmem:[%s1142_s14 + $0x20] sm:$0xff]  ;;  %v579_v2 = vld [vmem:[%s1142_s14 + $0x18] sm:$0xff]  ;;  %s906_s21 = sshra.s32 %s661_s22, 4  ;;  %s907_s21 = int_to_ptr.hbm [resolvable:$true] %s906_s21 }
  0x3f   : > { %566 = vmatpush.msra.mxu1 %v483_v41  ;;  %605 = vmatpush.msra.mxu3 %v589_v47  ;;  %v595_v3 = vld [vmem:[%s1142_s14 + $0x98] sm:$0xff]  ;;  %v578_v4 = vld [vmem:[%s1142_s14 + $0x10] sm:$0xff]  ;;  %v577_v6 = vld [vmem:[%s1142_s14 + $0x8] sm:$0xff]  ;;  %s908_s28 = scalar_lea.hbm %s907_s21, 8  ;;  %p913_p4 = scmp.lt.s32.totalorder %s907_s21, %s1224_s7 }
  0x40   : > { %539 = vmatpush.msrb.mxu0 %v465_v17  ;;  %503 = vmatpush.msra.mxu2 %v456_v24  ;;  %v594_v5 = vld [vmem:[%s1142_s14 + $0x90] sm:$0xff]  ;;  %v593_v7 = vld [vmem:[%s1142_s14 + $0x88] sm:$0xff]  ;;  %v576_v8 = vld [vmem:[%s1142_s14] sm:$0xff]  ;;  %p909_p6 = scmp.ne.s32.totalorder %s907_s21, %s908_s28  ;;  %p914_p5 = scmp.lt.s32.totalorder %s912_s8, %s908_s28 }
  0x41   : > { %567 = vmatpush.msra.mxu1 %v481_v42  ;;  %606 = vmatpush.msra.mxu3 %v588_v48  ;;  %v592_v9 = vld [vmem:[%s1142_s14 + $0x80] sm:$0xff] }
  0x42   : > { %540 = vmatpush.msrb.mxu0 %v463_v19  ;;  %504 = vmatpush.msra.mxu2 %v454_v26  ;;  %v484_v11 = vld [vmem:[%s378_s29] sm:$0x3]  ;;  %p910_p2 = pnand %p909_p6, %p1048_p11  ;;  %p915_p7 = por %p914_p5, %p913_p4 }
  0x43   : > { %568 = vmatpush.msra.mxu1 %v479_v43  ;;  %607 = vmatpush.msra.mxu3 %v587_v49  ;;  %v487_v12 = vperm.slane %v484_v11, 1  ;;  %v486_v13 = vperm.slane %v484_v11, 0 }
  0x44   : > { %541 = vmatpush.msrb.mxu0 %v461_v21  ;;  %505 = vmatpush.msra.mxu2 %v452_v28  ;;  %p911_p3 = pneg %p910_p2 }
  0x45   : > { %569 = vmatpush.msra.mxu1 %v477_v44  ;;  %608 = vmatpush.msra.mxu3 %v586_v50 }
  0x46   : > { %542 = vmatpush.msrb.mxu0 %v459_v23  ;;  %506 = vmatpush.msra.mxu2 %v450_v30  ;;  %v861_v23 = vld [vmem:[%s386_s9] ss:$0 sm:$0xff]  ;;  %p916_p8 = pnand %p915_p7, %p911_p3 }
  0x47   : > { %609 = vmatpush.msra.mxu3 %v585_v51 }
  0x48   : > { %543 = vmatpush.msrb.mxu0 %v457_v25  ;;  %507 = vmatpush.msra.mxu2 %v448_v32 }
  0x49   : > { %610 = vmatpush.msra.mxu3 %v584_v52 }
  0x4a   : > { %544 = vmatpush.msrb.mxu0 %v455_v27  ;;  %508 = vmatpush.msra.mxu2 %v446_v35 }
  0x4b   : > { %611 = vmatpush.msra.mxu3 %v583_v54 }
  0x4c   : > { %545 = vmatpush.msrb.mxu0 %v453_v29  ;;  %509 = vmatpush.msra.mxu2 %v444_v38 }
  0x4d   : > { %612 = vmatpush.msra.mxu3 %v582_v63 }
  0x4e   : > { %546 = vmatpush.msrb.mxu0 %v451_v31 }
  0x4f   : > { %613 = vmatpush.msra.mxu3 %v581_v0 }
  0x50   : > { %547 = vmatpush.msrb.mxu0 %v449_v34 }
  0x51   : > { %614 = vmatpush.msra.mxu3 %v580_v1 }
  0x52   : > { %548 = vmatpush.msrb.mxu0 %v447_v37 }
  0x53   : > { %615 = vmatpush.msra.mxu3 %v579_v2 }
  0x54   : > { %549 = vmatpush.msrb.mxu0 %v445_v40 }
  0x55   : > { %616 = vmatpush.msra.mxu3 %v578_v4 }
  0x57   : > { %617 = vmatpush.msra.mxu3 %v577_v6 }
  0x59   : > { %618 = vmatpush.msra.mxu3 %v576_v8 }
  0xb2   : > { %v419_v57 = vpop.f32.mrf.mxu0  ;;  %v439_v58 = vpop.f32.mrf.mxu1 }
  0xb3   : > { %v420_v59 = vadd.f32 %v419_v57, %v394_v55  ;;  %v440_v60 = vadd.f32 %v439_v58, %v395_v56 }
  0xb5   : > { %v442_v61 = vmax.f32 %v420_v59, 0.0  ;;  %v443_v62 = vmax.f32 %v440_v60, 0.0 }
  0xb7   : > { %510 = vmatmul.f32.vlgmr.msra.gmra.mxu2 %v442_v61  ;;  %801 = vmatmul.msk.f32.vlgmr.msrb.gmra.mxu1 %vm490_vm1, %v443_v62 }
  0xb8   : > { %550 = vmatmul.f32.vlgmr.msrb.gmra.mxu0 %v442_v61  ;;  %635 = vmatpush.msrb.mxu1 %v595_v3 }
  0xba   : > { %636 = vmatpush.msrb.mxu1 %v594_v5 }
  0xbc   : > { %637 = vmatpush.msrb.mxu1 %v593_v7 }
  0xbe   : > { %638 = vmatpush.msrb.mxu1 %v592_v9 }
  0xbf   : > { %802 = vmatmul.msk.f32.vlgmr.msra.gmra.mxu1 %vm490_vm1, %v443_v62 }
 0x134   : > { %v531_v10 = vpop.f32.mrf.mxu1 }
 0x135   : > { %v551_v14 = vpop.f32.mrf.mxu0 }
 0x136   : > { %v552_v16 = vadd.f32 %v551_v14, %v487_v12 }
 0x13a   : > { %v511_v15 = vpop.f32.mrf.mxu2 }
 0x13b   : > { %v512_v17 = vadd.f32 %v511_v15, %v486_v13 }
 0x13c   : > { %v571_v18 = vpop.f32.mrf.mxu1 }
 0x13d   : > { %v572_v19 = vadd.f32 %v571_v18, %v552_v16  ;;  %v532_v20 = vadd.f32 %v531_v10, %v512_v17 }
 0x13f   : > { %v575_v21 = vmax.f32 %v572_v19, 0.0  ;;  %v574_v22 = vmax.f32 %v532_v20, 0.0 }
 0x141   : > { %619 = vmatmul.f32.vlgmr.msra.gmra.mxu3 %v574_v22  ;;  %803 = vmatmul.msk.f32.vlgmr.msrb.gmra.mxu1 %vm490_vm1, %v575_v21 }
 0x1be   : > { %v640_v26 = vpop.f32.mrf.mxu1 }
 0x1c4   : > { %v620_v24 = vpop.f32.mrf.mxu3 }
 0x1c5   : > { %v621_v25 = vadd.f32 %v861_v23, %v620_v24 }
 0x1c7   : > { %v641_v27 = vadd.f32 %v640_v26, %v621_v25 }
 0x1c9   : > { %644 = vst.msk [vmem:[%s365_s26] sm:$0xff] %vm643_vm2, %v641_v27 }
 0x1ca   : > { %919 = shalt.err (!%p916_p8)
}
 0x1cb   : > { %815 = dma.vmem_to_hbm [thread:$0]  (%p1048_p11), %s659_s10, 128, %s661_s22, %s646_s20  }
 0x1cc PF: > { %s672_s19 = sand.u32 1, %s946_s24   ;;  %p822_p10 = pnand %p790_p9, %p1052_p12 }
 0x1cd   : > { %s673_s15 = scalar_lea.sflag [#allocation4], %s672_s19 }
 0x1ce   : > { %p823_p0 = pneg %p822_p10 }
 0x1d0   : > { %941 = dma.done.wait (%p823_p0), %s673_s15, 128  }
 0x1d1   : > { %943 = vsyncadd (%p823_p0), %s673_s15, 4294967168  ;;  %s1232_s17 = sld [smem:[#allocation8_spill]]  ;;  %p20_p1 = scmp.ge.s32.totalorder %s1027_s30, 4  }
 0x1d2   : > { %s1233_s26 = sld [smem:[#allocation9_spill]]  ;;  %s1234_s24 = smov %s950_s25 }
 0x1d3   : > { %s1236_s27 = smov %s1027_s30  ;;  %22 = sbr.rel (!%p20_p1) target bundleno = 5 (0x5), region = 108 }
 0x1d7   : > { %s1235_s25 = smov %s1232_s17 }
 0x1d8   :  { %679 = vsyncpa [#allocation3], 1 }
 0x1d9   :  { %681 = vsyncpa [#allocation3 + $0x1], 1 }
 0x1da   :  { %682 = vsyncpa [#allocation4], 1 }
 0x1db   :  { %684 = vsyncpa [#allocation4 + $0x1], 1 }

</bundles_post_ra>
